<compile_context>
chip_gen: v7x
topology: tpu7x:2x2x1
jax: 0.10.0
libtpu: 0.0.40
codegen_flags: <defaults>
</compile_context>

<pallas_src>
import jax
import jax.numpy as jnp
from jax.experimental import pallas as pl
from jax.experimental.pallas import tpu as pltpu

EPS = 1e-5
_MiB = 1024 * 1024


def _round_up(x, m):
    return ((x + m - 1) // m) * m


def _vmem_capacity_bytes():
    """Physical VMEM per TensorCore; falls back to 128 MiB if unqueryable."""
    try:
        info = pltpu.get_tpu_info()
        cap = int(getattr(info, "vmem_capacity_bytes", 128 * _MiB))
        if cap > 0:
            return cap
    except Exception:
        pass
    return 128 * _MiB


def _estimate_vmem(tile, tf, D, c_sz, x_sz):
    """Rough VMEM bytes: double-buffered blocks + scratch + ff1 intermediate."""
    return (2 * 2 * D * tf * c_sz          # W1 + W2 chunks, double-buffered
            + 2 * (tf + 3 * D) * 4         # b1 chunk + gamma/beta/b2
            + 2 * tile * D * x_sz          # x token tile (double-buffered)
            + 2 * tile * D * x_sz          # output tile
            + tile * D * (4 + c_sz)        # f32 accumulator + cached LN scratch
            + tile * tf * 4)               # ff1 f32 intermediate


def dense_moe_kernel(x_ref, g_ref, beta_ref, w1_ref, b1_ref, w2_ref, b2_ref,
                     o_ref, h_scratch, acc_ref):
    """One (tile, D) block of tokens x one tf-chunk of the FFN hidden dim."""
    j = pl.program_id(1)

    # --- first F chunk: LayerNorm the token tile once; fold residual + b2
    #     into the accumulator init so the epilogue is just a cast + store. ---
    @pl.when(j == 0)
    def _():
        x = x_ref[...].astype(jnp.float32)
        mean = jnp.mean(x, axis=-1, keepdims=True)
        xc = x - mean
        var = jnp.mean(xc * xc, axis=-1, keepdims=True)      # torch LN (biased)
        xn = xc * jax.lax.rsqrt(var + EPS)
        h = xn * g_ref[...] + beta_ref[...]                   # implicit (1,D) bcast
        h_scratch[...] = h.astype(h_scratch.dtype)
        acc_ref[...] = x + b2_ref[...]                        # residual + ff2 bias

    # --- ff1 chunk: bias + relu + cast fused (single pass over (tile, tf)),
    #     then partial ff2 accumulated in f32. ---
    h1 = jnp.dot(h_scratch[...], w1_ref[...],
                 preferred_element_type=jnp.float32)
    h1 = jnp.maximum(h1 + b1_ref[...], 0.0).astype(w2_ref.dtype)
    acc_ref[...] += jnp.dot(h1, w2_ref[...],
                            preferred_element_type=jnp.float32)

    # --- last F chunk: single store of the finished output tile. ---
    @pl.when(j == pl.num_programs(1) - 1)
    def _():
        o_ref[...] = acc_ref[...].astype(o_ref.dtype)


def dense_moe_sublayer(xs, gamma, beta, w1, b1, w2, b2, *,
                       token_tile=None, f_tile=None,
                       compute_dtype=jnp.bfloat16):
    """xs: (S, B, D). w1: (D, F), w2: (F, D). Returns (S, B, D) in xs.dtype."""
    S, B, D = xs.shape
    F = w1.shape[1]
    T = S * B

    vmem_cap = _vmem_capacity_bytes()
    small_vmem = vmem_cap <= 80 * _MiB          # v7x-class TC (64 MiB VMEM)

    # --- per-generation tile defaults ---
    if token_tile is None:
        token_tile = 512 if small_vmem else 1024
    if f_tile is None:
        if small_vmem:
            f_tile = 256 if D >= 2048 else 512
        else:
            f_tile = 1024
    token_tile = max(8, _round_up(token_tile, 8))
    f_tile = max(128, _round_up(f_tile, 128))

    # --- token tiling: large tiles, multiple of 8 sublanes, pad the tail ---
    tile = min(token_tile, _round_up(T, 8))
    if small_vmem and T >= 256:
        # v7x has two TensorCores: make sure the "parallel" token axis has at
        # least 2 tiles so both cores get work.
        tile = min(tile, _round_up(pl.cdiv(T, 2), 8))

    # --- F (hidden) chunking; any F is zero-padded up to a multiple of tf ---
    tf = _round_up(F, 128) if F <= f_tile else f_tile

    # --- shrink tiles until the estimated footprint fits 60% of VMEM ---
    c_sz = jnp.dtype(compute_dtype).itemsize
    x_sz = jnp.dtype(xs.dtype).itemsize
    budget = int(0.60 * vmem_cap)
    while _estimate_vmem(tile, tf, D, c_sz, x_sz) > budget:
        if tf > 128:
            tf = max(128, _round_up(tf // 2, 128))
        elif tile > 8:
            tile = max(8, _round_up(tile // 2, 8))
        else:
            break

    F_pad = _round_up(F, tf)
    n_f = F_pad // tf
    n_t = pl.cdiv(T, tile)
    T_pad = n_t * tile

    x2d = xs.reshape(T, D)
    if T_pad != T:
        # Zero rows are safe through LayerNorm (rsqrt(0 + eps) is finite) and
        # are sliced off below.
        x2d = jnp.pad(x2d, ((0, T_pad - T), (0, 0)))

    # bf16 (or f32) MXU operands; LN params and biases stay f32. Callers should
    # pre-cast weights to compute_dtype (astype is then a no-op); padded hidden
    # columns/rows are zero, so relu(h @ 0 + 0) @ w2_pad contributes exactly 0.
    w1_c = w1.astype(compute_dtype)
    w2_c = w2.astype(compute_dtype)
    b1_p = b1.astype(jnp.float32)
    if F_pad != F:
        w1_c = jnp.pad(w1_c, ((0, 0), (0, F_pad - F)))
        w2_c = jnp.pad(w2_c, ((0, F_pad - F), (0, 0)))
        b1_p = jnp.pad(b1_p, (0, F_pad - F))

    gamma2 = gamma.reshape(1, D).astype(jnp.float32)
    beta2 = beta.reshape(1, D).astype(jnp.float32)
    b1_2 = b1_p.reshape(1, F_pad)
    b2_2 = b2.reshape(1, D).astype(jnp.float32)

    # --- VMEM limit: 2x headroom over the estimate, capped below physical ---
    est = _estimate_vmem(tile, tf, D, c_sz, x_sz)
    vmem_limit = int(min(max(2 * est, 32 * _MiB), 0.75 * vmem_cap))
    vmem_limit = max(vmem_limit, min(int(1.25 * est), int(0.90 * vmem_cap)))

    const = lambda i, j: (0, 0)
    out = pl.pallas_call(
        dense_moe_kernel,
        out_shape=jax.ShapeDtypeStruct((T_pad, D), xs.dtype),
        grid_spec=pltpu.PrefetchScalarGridSpec(
            num_scalar_prefetch=0,
            grid=(n_t, n_f),
            in_specs=[
                pl.BlockSpec((tile, D), lambda i, j: (i, 0)),   # x token tile
                pl.BlockSpec((1, D), const),                    # gamma
                pl.BlockSpec((1, D), const),                    # beta
                pl.BlockSpec((D, tf), lambda i, j: (0, j)),     # W1 chunk
                pl.BlockSpec((1, tf), lambda i, j: (0, j)),     # b1 chunk
                pl.BlockSpec((tf, D), lambda i, j: (j, 0)),     # W2 chunk
                pl.BlockSpec((1, D), const),                    # b2
            ],
            out_specs=pl.BlockSpec((tile, D), lambda i, j: (i, 0)),
            scratch_shapes=[
                pltpu.VMEM((tile, D), compute_dtype),   # cached LayerNorm(x)
                pltpu.VMEM((tile, D), jnp.float32),     # ff2 accumulator
            ],
        ),
        compiler_params=pltpu.CompilerParams(
            dimension_semantics=("parallel", "arbitrary"),
            vmem_limit_bytes=vmem_limit,
        ),
    )(x2d, gamma2, beta2, w1_c, b1_2, w2_c, b2_2)

    return out[:T].reshape(S, B, D)


def _reference(xs, gamma, beta, w1, b1, w2, b2):
    x = xs.astype(jnp.float32)
    mean = jnp.mean(x, axis=-1, keepdims=True)
    var = jnp.mean((x - mean) ** 2, axis=-1, keepdims=True)
    h = (x - mean) * jax.lax.rsqrt(var + EPS) * gamma + beta
    h1 = jnp.maximum(h @ w1 + b1, 0.0)
    h2 = h1 @ w2 + b2
    return (xs + h2).astype(xs.dtype)


if __name__ == "__main__":
    # Small shapes implied by the module: decoder_embed_dim=32,
    # decoder_ffn_embed_dim=64, widex=1, seq=8, batch=2.
    S, B, D, FFN, WIDEX = 8, 2, 32, 64, 1
    F = FFN * WIDEX

    key = jax.random.PRNGKey(0)
    kx, kg, kb, kw1, kb1, kw2, kb2, kx2 = jax.random.split(key, 8)

    xs = jax.random.normal(kx, (S, B, D), dtype=jnp.float32)
    gamma = 1.0 + 0.1 * jax.random.normal(kg, (D,), dtype=jnp.float32)
    beta = 0.1 * jax.random.normal(kb, (D,), dtype=jnp.float32)

    bound1 = 1.0 / (D ** 0.5)
    w1 = jax.random.uniform(kw1, (D, F), jnp.float32, -bound1, bound1)
    b1 = jax.random.uniform(kb1, (F,), jnp.float32, -bound1, bound1)

    # NOTE: the module zero-inits ff2.weight; the test uses a random w2 so the
    # ff1/relu/ff2 path is actually validated (forward semantics are identical).
    bound2 = 1.0 / (F ** 0.5)
    w2 = jax.random.uniform(kw2, (F, D), jnp.float32, -bound2, bound2)
    b2 = jax.random.uniform(kb2, (D,), jnp.float32, -bound2, bound2)

    ref = _reference(xs, gamma, beta, w1, b1, w2, b2)

    # 1) exact-semantics path: f32 compute everywhere (also exercises the
    #    zero-padded F path since F=64 pads to 128).
    out_f32 = dense_moe_sublayer(xs, gamma, beta, w1, b1, w2, b2,
                                 compute_dtype=jnp.float32)
    out_f32 = jax.block_until_ready(out_f32)
    assert out_f32.shape == xs.shape and out_f32.dtype == xs.dtype
    assert jnp.allclose(out_f32, ref, atol=2e-2, rtol=2e-2), "f32 kernel mismatch"

    # 2) performance path (default): pre-cast bf16 MXU operands, f32 accumulation.
    w1_bf16 = w1.astype(jnp.bfloat16)
    w2_bf16 = w2.astype(jnp.bfloat16)
    out_bf16 = dense_moe_sublayer(xs, gamma, beta, w1_bf16, b1, w2_bf16, b2)
    out_bf16 = jax.block_until_ready(out_bf16)
    assert out_bf16.shape == xs.shape and out_bf16.dtype == xs.dtype
    assert jnp.allclose(out_bf16, ref, atol=5e-2, rtol=5e-2), "bf16 kernel mismatch"

    # 3) tail handling: seq*batch not a multiple of the (rounded) token tile.
    xs2 = jax.random.normal(kx2, (5, 3, D), dtype=jnp.float32)
    ref2 = _reference(xs2, gamma, beta, w1, b1, w2, b2)
    out2 = dense_moe_sublayer(xs2, gamma, beta, w1, b1, w2, b2,
                              compute_dtype=jnp.float32)
    out2 = jax.block_until_ready(out2)
    assert out2.shape == xs2.shape
    assert jnp.allclose(out2, ref2, atol=2e-2, rtol=2e-2), "tail-tile mismatch"

    print("KERNEL_OK")
</pallas_src>

<mosaic_0001>
module attributes {stable_mosaic.version = 11 : i64} {
  func.func @dense_moe_kernel(%arg0: i32, %arg1: i32, %arg2: memref<16x32xf32, #tpu.memory_space<vmem>>, %arg3: memref<1x32xf32, #tpu.memory_space<vmem>>, %arg4: memref<1x32xf32, #tpu.memory_space<vmem>>, %arg5: memref<32x128xf32, #tpu.memory_space<vmem>>, %arg6: memref<1x128xf32, #tpu.memory_space<vmem>>, %arg7: memref<128x32xf32, #tpu.memory_space<vmem>>, %arg8: memref<1x32xf32, #tpu.memory_space<vmem>>, %arg9: memref<16x32xf32, #tpu.memory_space<vmem>>, %arg10: memref<16x32xf32, #tpu.memory_space<vmem>>, %arg11: memref<16x32xf32, #tpu.memory_space<vmem>>) attributes {dimension_semantics = [#tpu.dimension_semantics<parallel>, #tpu.dimension_semantics<arbitrary>], iteration_bounds = array<i64: 1, 1>, scalar_prefetch = 0 : i64, scratch_operands = 2 : i64, tpu.core_type = #tpu.core_type<tc>, window_params = [{transform_indices = @transform_0, window_bounds = array<i64: 16, 32>}, {pipeline_mode = #tpu.pipeline_mode<synchronous>, transform_indices = @transform_1, window_bounds = array<i64: 1, 32>}, {pipeline_mode = #tpu.pipeline_mode<synchronous>, transform_indices = @transform_2, window_bounds = array<i64: 1, 32>}, {transform_indices = @transform_3, window_bounds = array<i64: 32, 128>}, {transform_indices = @transform_4, window_bounds = array<i64: 1, 128>}, {transform_indices = @transform_5, window_bounds = array<i64: 128, 32>}, {pipeline_mode = #tpu.pipeline_mode<synchronous>, transform_indices = @transform_6, window_bounds = array<i64: 1, 32>}, {transform_indices = @transform_7, window_bounds = array<i64: 16, 32>}]} {
    %c0_i32 = arith.constant 0 : i32
    %0 = arith.cmpi eq, %arg1, %c0_i32 : i32
    %1 = arith.extui %0 : i1 to i32
    %c0_i32_0 = arith.constant 0 : i32
    %2 = arith.cmpi ne, %1, %c0_i32_0 : i32
    scf.if %2 {
      %c0_16 = arith.constant 0 : index
      %c0_17 = arith.constant 0 : index
      %19 = vector.load %arg2[%c0_16, %c0_17] : memref<16x32xf32, #tpu.memory_space<vmem>>, vector<16x32xf32>
      %cst_18 = arith.constant dense<0.000000e+00> : vector<16xf32>
      %20 = vector.multi_reduction <add>, %19, %cst_18 [1] : vector<16x32xf32> to vector<16xf32>
      %21 = vector.shape_cast %20 : vector<16xf32> to vector<16x1xf32>
      %cst_19 = arith.constant 3.200000e+01 : f32
      %22 = vector.broadcast %cst_19 : f32 to vector<16x1xf32>
      %23 = arith.divf %21, %22 : vector<16x1xf32>
      %24 = vector.broadcast %23 : vector<16x1xf32> to vector<16x32xf32>
      %25 = arith.subf %19, %24 : vector<16x32xf32>
      %26 = arith.mulf %25, %25 : vector<16x32xf32>
      %cst_20 = arith.constant dense<0.000000e+00> : vector<16xf32>
      %27 = vector.multi_reduction <add>, %26, %cst_20 [1] : vector<16x32xf32> to vector<16xf32>
      %28 = vector.shape_cast %27 : vector<16xf32> to vector<16x1xf32>
      %cst_21 = arith.constant 3.200000e+01 : f32
      %29 = vector.broadcast %cst_21 : f32 to vector<16x1xf32>
      %30 = arith.divf %28, %29 : vector<16x1xf32>
      %cst_22 = arith.constant 9.99999974E-6 : f32
      %31 = vector.broadcast %cst_22 : f32 to vector<16x1xf32>
      %32 = arith.addf %30, %31 : vector<16x1xf32>
      %33 = math.rsqrt %32 : vector<16x1xf32>
      %34 = vector.broadcast %33 : vector<16x1xf32> to vector<16x32xf32>
      %35 = arith.mulf %25, %34 : vector<16x32xf32>
      %c0_23 = arith.constant 0 : index
      %c0_24 = arith.constant 0 : index
      %36 = vector.load %arg3[%c0_23, %c0_24] : memref<1x32xf32, #tpu.memory_space<vmem>>, vector<1x32xf32>
      %37 = vector.broadcast %36 : vector<1x32xf32> to vector<16x32xf32>
      %38 = arith.mulf %35, %37 : vector<16x32xf32>
      %c0_25 = arith.constant 0 : index
      %c0_26 = arith.constant 0 : index
      %39 = vector.load %arg4[%c0_25, %c0_26] : memref<1x32xf32, #tpu.memory_space<vmem>>, vector<1x32xf32>
      %40 = vector.broadcast %39 : vector<1x32xf32> to vector<16x32xf32>
      %41 = arith.addf %38, %40 : vector<16x32xf32>
      %c0_27 = arith.constant 0 : index
      %c0_28 = arith.constant 0 : index
      %42 = vector.load %arg10[%c0_27, %c0_28] : memref<16x32xf32, #tpu.memory_space<vmem>>, vector<16x32xf32>
      tpu.vector_store %arg10[%c0_27, %c0_28], %41 {strides = array<i32>} : memref<16x32xf32, #tpu.memory_space<vmem>>, vector<16x32xf32>,
      %c0_29 = arith.constant 0 : index
      %c0_30 = arith.constant 0 : index
      %43 = vector.load %arg8[%c0_29, %c0_30] : memref<1x32xf32, #tpu.memory_space<vmem>>, vector<1x32xf32>
      %44 = vector.broadcast %43 : vector<1x32xf32> to vector<16x32xf32>
      %45 = arith.addf %19, %44 : vector<16x32xf32>
      %c0_31 = arith.constant 0 : index
      %c0_32 = arith.constant 0 : index
      %46 = vector.load %arg11[%c0_31, %c0_32] : memref<16x32xf32, #tpu.memory_space<vmem>>, vector<16x32xf32>
      tpu.vector_store %arg11[%c0_31, %c0_32], %45 {strides = array<i32>} : memref<16x32xf32, #tpu.memory_space<vmem>>, vector<16x32xf32>,
    } else {
    }
    %c0 = arith.constant 0 : index
    %c0_1 = arith.constant 0 : index
    %3 = vector.load %arg10[%c0, %c0_1] : memref<16x32xf32, #tpu.memory_space<vmem>>, vector<16x32xf32>
    %c0_2 = arith.constant 0 : index
    %c0_3 = arith.constant 0 : index
    %4 = vector.load %arg5[%c0_2, %c0_3] : memref<32x128xf32, #tpu.memory_space<vmem>>, vector<32x128xf32>
    %cst = arith.constant dense<0.000000e+00> : vector<16x128xf32>
    %5 = tpu.matmul %3, %4, %cst {dimension_numbers = #tpu.dot_dimension_numbers<[1], [0], [0], [1], [0, 0, 1, 1], [], []>} : vector<16x32xf32>, vector<32x128xf32>, vector<16x128xf32> -> vector<16x128xf32>
    %c0_4 = arith.constant 0 : index
    %c0_5 = arith.constant 0 : index
    %6 = vector.load %arg6[%c0_4, %c0_5] : memref<1x128xf32, #tpu.memory_space<vmem>>, vector<1x128xf32>
    %7 = vector.broadcast %6 : vector<1x128xf32> to vector<16x128xf32>
    %8 = arith.addf %5, %7 : vector<16x128xf32>
    %cst_6 = arith.constant 0.000000e+00 : f32
    %9 = vector.broadcast %cst_6 : f32 to vector<16x128xf32>
    %10 = arith.maximumf %8, %9 : vector<16x128xf32>
    %c0_7 = arith.constant 0 : index
    %c0_8 = arith.constant 0 : index
    %11 = vector.load %arg11[%c0_7, %c0_8] : memref<16x32xf32, #tpu.memory_space<vmem>>, vector<16x32xf32>
    %c0_9 = arith.constant 0 : index
    %c0_10 = arith.constant 0 : index
    %12 = vector.load %arg7[%c0_9, %c0_10] : memref<128x32xf32, #tpu.memory_space<vmem>>, vector<128x32xf32>
    %cst_11 = arith.constant dense<0.000000e+00> : vector<16x32xf32>
    %13 = tpu.matmul %10, %12, %cst_11 {dimension_numbers = #tpu.dot_dimension_numbers<[1], [0], [0], [1], [0, 0, 1, 1], [], []>} : vector<16x128xf32>, vector<128x32xf32>, vector<16x32xf32> -> vector<16x32xf32>
    %14 = arith.addf %11, %13 : vector<16x32xf32>
    %c0_12 = arith.constant 0 : index
    %c0_13 = arith.constant 0 : index
    %15 = vector.load %arg11[%c0_12, %c0_13] : memref<16x32xf32, #tpu.memory_space<vmem>>, vector<16x32xf32>
    tpu.vector_store %arg11[%c0_12, %c0_13], %14 {strides = array<i32>} : memref<16x32xf32, #tpu.memory_space<vmem>>, vector<16x32xf32>,
    %c0_i32_14 = arith.constant 0 : i32
    %16 = arith.cmpi eq, %arg1, %c0_i32_14 : i32
    %17 = arith.extui %16 : i1 to i32
    %c0_i32_15 = arith.constant 0 : i32
    %18 = arith.cmpi ne, %17, %c0_i32_15 : i32
    scf.if %18 {
      %c0_16 = arith.constant 0 : index
      %c0_17 = arith.constant 0 : index
      %19 = vector.load %arg11[%c0_16, %c0_17] : memref<16x32xf32, #tpu.memory_space<vmem>>, vector<16x32xf32>
      %c0_18 = arith.constant 0 : index
      %c0_19 = arith.constant 0 : index
      %20 = vector.load %arg9[%c0_18, %c0_19] : memref<16x32xf32, #tpu.memory_space<vmem>>, vector<16x32xf32>
      tpu.vector_store %arg9[%c0_18, %c0_19], %19 {strides = array<i32>} : memref<16x32xf32, #tpu.memory_space<vmem>>, vector<16x32xf32>,
    } else {
    }
    return
  }
  func.func @transform_0(%arg0: i32, %arg1: i32) -> (i32, i32) {
    %c0_i32 = arith.constant 0 : i32
    %c0_i32_0 = arith.constant 0 : i32
    return %arg0, %c0_i32 : i32, i32
  }
  func.func @transform_1(%arg0: i32, %arg1: i32) -> (i32, i32) {
    %c0_i32 = arith.constant 0 : i32
    %c0_i32_0 = arith.constant 0 : i32
    %c0_i32_1 = arith.constant 0 : i32
    return %c0_i32, %c0_i32_0 : i32, i32
  }
  func.func @transform_2(%arg0: i32, %arg1: i32) -> (i32, i32) {
    %c0_i32 = arith.constant 0 : i32
    %c0_i32_0 = arith.constant 0 : i32
    %c0_i32_1 = arith.constant 0 : i32
    return %c0_i32, %c0_i32_0 : i32, i32
  }
  func.func @transform_3(%arg0: i32, %arg1: i32) -> (i32, i32) {
    %c0_i32 = arith.constant 0 : i32
    %c0_i32_0 = arith.constant 0 : i32
    return %c0_i32, %arg1 : i32, i32
  }
  func.func @transform_4(%arg0: i32, %arg1: i32) -> (i32, i32) {
    %c0_i32 = arith.constant 0 : i32
    %c0_i32_0 = arith.constant 0 : i32
    return %c0_i32, %arg1 : i32, i32
  }
  func.func @transform_5(%arg0: i32, %arg1: i32) -> (i32, i32) {
    %c0_i32 = arith.constant 0 : i32
    %c0_i32_0 = arith.constant 0 : i32
    return %arg1, %c0_i32 : i32, i32
  }
  func.func @transform_6(%arg0: i32, %arg1: i32) -> (i32, i32) {
    %c0_i32 = arith.constant 0 : i32
    %c0_i32_0 = arith.constant 0 : i32
    %c0_i32_1 = arith.constant 0 : i32
    return %c0_i32, %c0_i32_0 : i32, i32
  }
  func.func @transform_7(%arg0: i32, %arg1: i32) -> (i32, i32) {
    %c0_i32 = arith.constant 0 : i32
    %c0_i32_0 = arith.constant 0 : i32
    return %arg0, %c0_i32 : i32, i32
  }
}

</mosaic_0001>

<bundles_post_ra>
// kernel: tpu_custom_call.1
= control target key start
LH: loop header
LB: loop body
LE: loop exit
PB: predicated region body
PF: predicated region fallthrough
CT: control target
= control target key end

     0   :  { %vm33_vm0 = vcmask 261120   ;;  %s613_s0 = inlined_call_operand.vmem [shape: f32[16,32], index: 0, kind: input, shape index: {}]   ;;  %s614_s1 = inlined_call_operand.vmem [shape: f32[1,32], index: 1, kind: input, shape index: {}]   ;;  %s615_s2 = inlined_call_operand.vmem [shape: f32[1,32], index: 2, kind: input, shape index: {}]   ;;  %s616_s3 = inlined_call_operand.vmem [shape: f32[32,128], index: 3, kind: input, shape index: {}]   ;;  %s617_s4 = inlined_call_operand.vmem [shape: f32[1,128], index: 4, kind: input, shape index: {}]   ;;  %s618_s5 = inlined_call_operand.vmem [shape: f32[128,32], index: 5, kind: input, shape index: {}]   ;;  %s619_s6 = inlined_call_operand.vmem [shape: f32[1,32], index: 6, kind: input, shape index: {}]   ;;  %s620_s7 = inlined_call_operand.hbm [shape: f32[16,32], index: 7, kind: output, shape index: {}]  }
   0x1   :  { %v31_v0 = vld [vmem:[%s613_s0] sm:$0xff]  ;;  %v32_v2 = vld [vmem:[%s613_s0 + $0x8] sm:$0xff] }
   0x2   :  { %v311_v1 = vld [vmem:[%s619_s6] ss:$0 sm:$0xff]  ;;  %v34_v3 = vsel %vm33_vm0, %v31_v0, 0.0 }
   0x3   :  { %v88_v4 = vadd.f32 %v311_v1, %v31_v0  ;;  %v89_v5 = vadd.f32 %v311_v1, %v32_v2 }
   0x4   :  { %12 = vsyncpa [#allocation5], 0  ;;  %35 = vadd.xlane.f32.xlu0 %v34_v3  ;;  %v37_v6 = vsel %vm33_vm0, %v32_v2, 0.0  ;;  %v94_v17 = vld [vmem:[%s616_s3] sm:$0xff]  ;;  %v95_v18 = vld [vmem:[%s616_s3 + $0x8] sm:$0xff] }
   0x5   :  { %90 = vst.msk [vmem:[#allocation3] sm:$0xff] %vm33_vm0, %v88_v4  ;;  %91 = vst.msk [vmem:[#allocation3 + $0x8] sm:$0xff] %vm33_vm0, %v89_v5  ;;  %v385_v19 = vpack.c.bf16 %v95_v18, %v94_v17  ;;  %v96_v20 = vld [vmem:[%s616_s3 + $0x10] sm:$0xff]  ;;  %v97_v21 = vld [vmem:[%s616_s3 + $0x18] sm:$0xff] }
   0x6   :  { %v389_v22 = vpack.c.bf16 %v97_v21, %v96_v20  ;;  %v191_v23 = vld [vmem:[%s618_s5] sm:$0xff]  ;;  %v192_v24 = vld [vmem:[%s618_s5 + $0x8] sm:$0xff]  ;;  %v193_v25 = vld [vmem:[%s618_s5 + $0x10] sm:$0xff] }
   0x7   :  { %386 = vmatprep.subr.bf16.mxu0 %v385_v19  ;;  %v393_v26 = vpack.c.bf16 %v192_v24, %v191_v23  ;;  %v194_v27 = vld [vmem:[%s618_s5 + $0x18] sm:$0xff]  ;;  %v195_v29 = vld [vmem:[%s618_s5 + $0x20] sm:$0xff]  ;;  %v196_v30 = vld [vmem:[%s618_s5 + $0x28] sm:$0xff] }
   0x8   :  { %38 = vadd.xlane.f32.xlu0 %v37_v6  ;;  %388 = vmatpush3.bf16.msra.mxu0 %v385_v19  ;;  %v397_v28 = vpack.c.bf16 %v194_v27, %v193_v25  ;;  %v401_v31 = vpack.c.bf16 %v196_v30, %v195_v29  ;;  %v197_v32 = vld [vmem:[%s618_s5 + $0x30] sm:$0xff]  ;;  %v198_v33 = vld [vmem:[%s618_s5 + $0x38] sm:$0xff]  ;;  %v199_v35 = vld [vmem:[%s618_s5 + $0x40] sm:$0xff] }
   0x9   :  { %390 = vmatprep.subr.bf16.mxu0 %v389_v22  ;;  %394 = vmatprep.subr.bf16.mxu1 %v393_v26  ;;  %v405_v34 = vpack.c.bf16 %v198_v33, %v197_v32  ;;  %v200_v36 = vld [vmem:[%s618_s5 + $0x48] sm:$0xff]  ;;  %v201_v38 = vld [vmem:[%s618_s5 + $0x50] sm:$0xff]  ;;  %v202_v39 = vld [vmem:[%s618_s5 + $0x58] sm:$0xff] }
   0xa   :  { %396 = vmatpush3.bf16.msra.mxu1 %v393_v26  ;;  %v409_v37 = vpack.c.bf16 %v200_v36, %v199_v35  ;;  %v413_v40 = vpack.c.bf16 %v202_v39, %v201_v38  ;;  %v203_v41 = vld [vmem:[%s618_s5 + $0x60] sm:$0xff]  ;;  %v204_v42 = vld [vmem:[%s618_s5 + $0x68] sm:$0xff]  ;;  %v205_v62 = vld [vmem:[%s618_s5 + $0x70] sm:$0xff] }
   0xb   :  { %398 = vmatprep.subr.bf16.mxu1 %v397_v28  ;;  %v417_v43 = vpack.c.bf16 %v204_v42, %v203_v41  ;;  %v309_v51 = vld [vmem:[%s614_s1] ss:$0 sm:$0xff]  ;;  %v206_v63 = vld [vmem:[%s618_s5 + $0x78] sm:$0xff]  ;;  %s456_s5 = smov [#allocation4]  }
   0xc   :  { %392 = vmatpush3.bf16.msra.mxu0 %v389_v22  ;;  %v310_v53 = vld [vmem:[%s615_s2] ss:$0 sm:$0xff] }
   0xd   :  { %v312_v1 = vld [vmem:[%s617_s4] ss:$0 sm:$0xff]  ;;  %s298_s4 = sshll.u32 %s456_s5, 4  ;;  %s299_s4 = int_to_ptr.vmem [resolvable:$true] %s298_s4 }
   0xe   :  { %400 = vmatpush3.bf16.msra.mxu1 %v397_v28  ;;  %s432_s22 = scalar_lea.vmem %s299_s4, 256  ;;  %p437_p1 = scmp.lt.s32.totalorder %s299_s4, %s299_s4 }
   0xf   :  { %402 = vmatprep.subr.bf16.mxu1 %v401_v31  ;;  %p433_p0 = scmp.ne.s32.totalorder %s299_s4, %s432_s22  ;;  %p438_p2 = scmp.lt.s32.totalorder %s432_s22, %s432_s22 }
  0x11   :  { %p439_p3 = por %p438_p2, %p437_p1 }
  0x12   :  { %404 = vmatpush3.bf16.msra.mxu1 %v401_v31 }
  0x13   :  { %406 = vmatprep.subr.bf16.mxu1 %v405_v34  ;;  %p440_p4 = pnand %p439_p3, %p433_p0 }
  0x16   :  { %408 = vmatpush3.bf16.msra.mxu1 %v405_v34 }
  0x17   :  { %410 = vmatprep.subr.bf16.mxu1 %v409_v37 }
  0x1a   :  { %412 = vmatpush3.bf16.msra.mxu1 %v409_v37 }
  0x1b   :  { %414 = vmatprep.subr.bf16.mxu1 %v413_v40 }
  0x1e   :  { %416 = vmatpush3.bf16.msra.mxu1 %v413_v40 }
  0x1f   :  { %418 = vmatprep.subr.bf16.mxu1 %v417_v43 }
  0x22   :  { %420 = vmatpush3.bf16.msra.mxu1 %v417_v43 }
  0x91   :  { %v36_v7 = vpop.xlane.xlu0 %35 }
  0x92   :  { %v41_v8 = vmul.f32 0.03125, %v36_v7 }
  0x94   :  { %v512_v9 = vsub.f32 %v31_v0, %v41_v8  ;;  %v421_v0 = vpack.c.bf16 %v206_v63, %v205_v62  ;;  %v190_v8 = vld [vmem:[#allocation3 + $0x8] sm:$0xff] }
  0x95   :  { %v39_v10 = vpop.xlane.xlu0 %38 }
  0x96   :  { %v42_v11 = vmul.f32 0.03125, %v39_v10  ;;  %v45_v12 = vmul.f32 %v512_v9, %v512_v9  ;;  %422 = vmatprep.subr.bf16.mxu1 %v421_v0 }
  0x97   :  { %424 = vmatpush3.bf16.msra.mxu1 %v421_v0 }
  0x98   :  { %v516_v13 = vsub.f32 %v32_v2, %v42_v11  ;;  %v47_v14 = vsel %vm33_vm0, %v45_v12, 0.0 }
  0x99   :  { %48 = vadd.xlane.f32.xlu1 %v47_v14 }
  0x9a   :  { %v46_v15 = vmul.f32 %v516_v13, %v516_v13 }
  0x9c   :  { %v50_v16 = vsel %vm33_vm0, %v46_v15, 0.0 }
  0x9d   :  { %51 = vadd.xlane.f32.xlu1 %v50_v16 }
 0x126   :  { %v49_v44 = vpop.xlane.xlu1 %48 }
 0x127   :  { %v53_v45 = vmul.f32 0.03125, %v49_v44 }
 0x129   :  { %v55_v46 = vadd.f32 1e-05, %v53_v45 }
 0x12a   :  { %v52_v47 = vpop.xlane.xlu1 %51 }
 0x12b   :  { %428 = vrsqrt.f32 %v55_v46  ;;  %v54_v48 = vmul.f32 0.03125, %v52_v47 }
 0x12d   :  { %v56_v49 = vadd.f32 1e-05, %v54_v48 }
 0x12f   :  { %430 = vrsqrt.f32 %v56_v49 }
 0x135   :  { %v429_v50 = vpop.eup %428 }
 0x136   :  { %v59_v52 = vmul.f32 %v429_v50, %v512_v9  ;;  %v189_v9 = vld [vmem:[#allocation3] sm:$0xff] }
 0x138   :  { %v68_v54 = vmul.f32 %v309_v51, %v59_v52 }
 0x139   :  { %v431_v55 = vpop.eup %430 }
 0x13a   :  { %v77_v56 = vadd.f32 %v310_v53, %v68_v54  ;;  %v60_v57 = vmul.f32 %v431_v55, %v516_v13 }
 0x13c   :  { %79 = vst.msk [vmem:[#allocation2] sm:$0xff] %vm33_vm0, %v77_v56  ;;  %v69_v58 = vmul.f32 %v309_v51, %v60_v57 }
 0x13e   :  { %v78_v59 = vadd.f32 %v310_v53, %v69_v58 }
 0x140   :  { %80 = vst.msk [vmem:[#allocation2 + $0x8] sm:$0xff] %vm33_vm0, %v78_v59 }
 0x143   :  { %v92_v60 = vld [vmem:[#allocation2] sm:$0xff] }
 0x144   :  { %347 = vmatprep.mubr.msk.f32.mxu0 %vm33_vm0, %v92_v60 }
 0x147   :  { %v93_v61 = vld [vmem:[#allocation2 + $0x8] sm:$0xff] }
 0x148   :  { %348 = vmatmul.mubr.msk.f32.vlgmr.msra.gmra.mrb[0].mxu0 %vm33_vm0, %v93_v61 }
 0x21b   :  { %v349_v2 = vpop.f32.mrb[0].mxu0 }
 0x21c   :  { %v184_v3 = vadd.f32 %v349_v2, %v312_v1  ;;  %v178_v4 = vpop.f32.mrb[1].mxu0 }
 0x21d   :  { %v179_v5 = vadd.f32 %v312_v1, %v178_v4 }
 0x21e   :  { %v188_v7 = vmax.f32 %v184_v3, 0.0 }
 0x21f   :  { %v187_v6 = vmax.f32 %v179_v5, 0.0 }
 0x221   :  { %382 = vmatprep.mubr.f32.mxu1 %v187_v6 }
 0x222   :  { %383 = vmatmul.mubr.f32.vlgmr.msra.gmra.mrb[0].mxu1 %v188_v7 }
 0x2f5   :  { %v384_v10 = vpop.f32.mrb[0].mxu1 }
 0x2f6   :  { %v283_v11 = vadd.f32 %v384_v10, %v190_v8  ;;  %v273_v12 = vpop.f32.mrb[1].mxu1 }
 0x2f7   :  { %v282_v13 = vadd.f32 %v273_v12, %v189_v9 }
 0x2f8   :  { %285 = vst.msk [vmem:[#allocation3 + $0x8] sm:$0xff] %vm33_vm0, %v283_v11 }
 0x2f9   :  { %284 = vst.msk [vmem:[#allocation3] sm:$0xff] %vm33_vm0, %v282_v13 }
 0x2ff   :  { %v290_v14 = vld [vmem:[#allocation3 + $0x8] sm:$0xff] }
 0x300   :  { %v289_v15 = vld [vmem:[#allocation3] sm:$0xff]  ;;  %292 = vst.msk [vmem:[#allocation4 + $0x8] sm:$0xff] %vm33_vm0, %v290_v14 }
 0x301   :  { %291 = vst.msk [vmem:[#allocation4] sm:$0xff] %vm33_vm0, %v289_v15 }
 0x302   :  { %443 = shalt.err (!%p440_p4)
}
 0x303   :  { %s444_s25 = scalar_lea.hbm %s620_s7, 256 }
 0x304   :  { %p445_p5 = scmp.ne.s32.totalorder %s620_s7, %s444_s25  ;;  %p448_p6 = scmp.lt.u32.totalorder %s444_s25, %s620_s7 }
 0x306   :  { %p450_p7 = pnand %p448_p6, %p445_p5 }
 0x308   :  { %453 = shalt.err (!%p450_p7)
}
 0x309   :  { %s457_s0 = smov 128   ;;  %s458_s6 = smov 8  }
 0x30a   :  { %304 = dma.vmem_to_hbm [thread:$0]  %s299_s4, 256, %s620_s7, [#allocation5], %s457_s0, %s457_s0, %s458_s6  }
 0x30b   :  { %454 = dma.done.wait [#allocation5], 256  }
 0x30c   :  { %455 = vsyncadd [#allocation5], 4294967040 }
 0x30d   :  { %308 = vsyncpa [#allocation5], 1 }

</bundles_post_ra>
